<compile_context>
chip_gen: v5e
topology: v5e:2x2
jax: 0.10.0
libtpu: 0.0.40
codegen_flags: <defaults>
</compile_context>

<pallas_src>
import math

import jax
import jax.numpy as jnp
from jax.experimental import pallas as pl
from jax.experimental.pallas import tpu as pltpu


# ----------------------------- kernel bodies ------------------------------- #

def _mlp_logprobs(x_ref, w1t_ref, b1_ref, w2t_ref, b2_ref):
    """Shared body: node-minor (C_out, tn) float32 log-probabilities."""
    xv = x_ref[...]
    if xv.dtype != jnp.float32:
        xv = xv.astype(jnp.float32)          # bf16-streamed x; weights stay f32

    # ---- fc1 + ReLU, node-minor:  h = W1^T @ x^T  -> (C_hid, tn) ------------
    h = jax.lax.dot_general(
        w1t_ref[...], xv,
        dimension_numbers=(((1,), (1,)), ((), ())),     # contract the C_in axes
        preferred_element_type=jnp.float32)
    h = jnp.maximum(h + b1_ref[...], 0.0)               # bias broadcasts over lanes

    # ---- dropout: identity at inference --------------------------------------
    # TODO(synk): a training-mode variant would build the keep-mask with
    # pltpu.prng_seed + pltpu.prng_random_bits.

    # ---- fc2, node-minor:  logits = W2^T @ h  -> (C_out, tn) -----------------
    logits = jnp.dot(w2t_ref[...], h, preferred_element_type=jnp.float32)
    logits = logits + b2_ref[...]

    # ---- log_softmax over the class axis (sublane axis, dense exp) -----------
    m = jnp.max(logits, axis=0, keepdims=True)
    shifted = logits - m
    lse = jnp.log(jnp.sum(jnp.exp(shifted), axis=0, keepdims=True))
    return shifted - lse                                  # (C_out, tn) f32


def _kernel_packed(x_ref, w1t_ref, b1_ref, w2t_ref, b2_ref, o_ref):
    # o_ref: (tn // npr, npr * C_out) — lane-dense, and its flat layout equals
    # row-major (tn, C_out), so HBM holds the PyTorch layout directly.
    lp = _mlp_logprobs(x_ref, w1t_ref, b1_ref, w2t_ref, b2_ref)   # (C_out, tn)
    rows, width = o_ref.shape
    o_ref[...] = lp.T.reshape(rows, width).astype(o_ref.dtype)


def _kernel_nodeminor(x_ref, w1t_ref, b1_ref, w2t_ref, b2_ref, o_ref):
    # Fallback: o_ref is (C_out, tn); the wrapper transposes (extra HBM pass).
    lp = _mlp_logprobs(x_ref, w1t_ref, b1_ref, w2t_ref, b2_ref)
    o_ref[...] = lp.astype(o_ref.dtype)


# ------------------------------- wrapper ----------------------------------- #

_DEFAULT_ROW_TILE = 16 * 1024          # rows / grid step; sweep 8K..32K per chip
_VMEM_LIMIT_BYTES = 48 * 1024 * 1024   # fits v7x (64 MiB physical), ample on v5e/v6e
_MIN_GRID_STEPS = 8                    # keep both v7x TCs + the pipeline busy

_packed_ok_cache = {}                  # spec -> whether the packed path lowers


def _round_up(a, b):
    return -(-a // b) * b


def node_feature_model(x, w1, b1, w2, b2, *, row_tile=None,
                       out_dtype=jnp.float32):
    """log_softmax(relu(x @ w1 + b1) @ w2 + b2, axis=1) as [N, C_out].

    x: [N, C_in] (float32 or bfloat16 — bf16 halves the x HBM stream; weights
    stay float32, x is upcast inside the kernel).  out_dtype=jnp.bfloat16
    additionally halves the output write traffic (argmax/NLL-grade precision).
    """
    N, C_in = x.shape
    C_hid = w1.shape[1]
    C_out = w2.shape[1]

    # Packing geometry: npr nodes per packed output row makes the row width a
    # multiple of 128 lanes -> unmasked vector stores + dense HBM layout, and
    # the flat layout equals row-major (N, C_out).
    npr = 128 // math.gcd(C_out, 128)
    quantum = max(16 * npr, 128)       # row-tile quantum: packing + tiling safe

    # Row tile: big enough to amortize ~0.35us/step overhead, small enough for
    # double-buffered lane-padded x blocks in VMEM, split into >= 8 grid steps.
    target = _round_up(row_tile if row_tile is not None else _DEFAULT_ROW_TILE,
                       quantum)
    tn = min(target,
             max(quantum, _round_up(pl.cdiv(N, _MIN_GRID_STEPS), quantum)))
    n_pad = _round_up(N, tn)
    if n_pad != N:
        x = jnp.pad(x, ((0, n_pad - N), (0, 0)))          # zero rows, sliced off
    grid = (n_pad // tn,)

    # Weights stay f32 (no weight quantization on the bf16-x path); biases as
    # (C, 1) columns so they broadcast over the node/lane axis in-kernel.
    w1t = jnp.asarray(w1.T, dtype=jnp.float32)             # (C_hid, C_in)
    w2t = jnp.asarray(w2.T, dtype=jnp.float32)             # (C_out, C_hid)
    b1c = b1.reshape(C_hid, 1).astype(jnp.float32)
    b2c = b2.reshape(C_out, 1).astype(jnp.float32)

    in_specs = [
        # TODO(synk): audit XLA's HBM layout of (N, C_in=16) x with
        # pl.lower_as_mlir; if it is (8,128)-lane padded, pack nodes into the
        # lane dim upstream to avoid streaming padded bytes.
        pl.BlockSpec((tn, C_in), lambda i: (i, 0)),        # x row tile
        pl.BlockSpec((C_hid, C_in), lambda i: (0, 0)),     # W1^T (resident)
        pl.BlockSpec((C_hid, 1), lambda i: (0, 0)),        # b1
        pl.BlockSpec((C_out, C_hid), lambda i: (0, 0)),    # W2^T (resident)
        pl.BlockSpec((C_out, 1), lambda i: (0, 0)),        # b2
    ]
    compiler_params = pltpu.CompilerParams(
        dimension_semantics=("parallel",),                 # node tiles -> megacore
        vmem_limit_bytes=_VMEM_LIMIT_BYTES)
    out_itemsize = jnp.dtype(out_dtype).itemsize
    cost = pl.CostEstimate(
        flops=2 * n_pad * (C_in * C_hid + C_hid * C_out),
        transcendentals=n_pad * (C_out + 1),
        bytes_accessed=(x.size * x.dtype.itemsize
                        + n_pad * C_out * out_itemsize
                        + (w1t.size + w2t.size) * 4),
    )
    args = (x, w1t, b1c, w2t, b2c)

    key = (C_in, C_hid, C_out, tn, n_pad, str(x.dtype), str(jnp.dtype(out_dtype)))
    if _packed_ok_cache.get(key, True):
        try:
            out_p = pl.pallas_call(
                _kernel_packed,
                out_shape=jax.ShapeDtypeStruct((n_pad // npr, npr * C_out),
                                               out_dtype),
                grid_spec=pltpu.PrefetchScalarGridSpec(
                    num_scalar_prefetch=0,
                    grid=grid,
                    in_specs=in_specs,
                    out_specs=pl.BlockSpec((tn // npr, npr * C_out),
                                           lambda i: (i, 0)),
                ),
                compiler_params=compiler_params,
                cost_estimate=cost,
            )(*args)
            _packed_ok_cache[key] = True
            # Free row-major reshape back to (N, C_out); drop padded rows.
            return out_p.reshape(n_pad, C_out)[:N]
        except Exception:
            # Mosaic could not lower the in-kernel packing relayout for this
            # shape; fall back to node-minor output + XLA transpose.  (The
            # fallback only engages for eager calls; under jit the packed path
            # is assumed to lower.)
            _packed_ok_cache[key] = False

    out_t = pl.pallas_call(
        _kernel_nodeminor,
        out_shape=jax.ShapeDtypeStruct((C_out, n_pad), out_dtype),
        grid_spec=pltpu.PrefetchScalarGridSpec(
            num_scalar_prefetch=0,
            grid=grid,
            in_specs=in_specs,
            out_specs=pl.BlockSpec((C_out, tn), lambda i: (0, i)),
        ),
        compiler_params=compiler_params,
        cost_estimate=cost,
    )(*args)
    return out_t[:, :N].T


# ------------------------------ reference ---------------------------------- #

def _reference(x, w1, b1, w2, b2):
    h = jnp.maximum(x @ w1 + b1, 0.0)
    logits = h @ w2 + b2
    return jax.nn.log_softmax(logits, axis=1)


if __name__ == "__main__":
    # Small shapes consistent with the module's forward pass.
    N = 8                 # number of nodes (data.x rows)
    in_channels = 16
    hidden_channels = 32
    out_channels = 8
    dropout_rate = 0.5    # identity at inference (kept for spec parity)

    key = jax.random.PRNGKey(0)
    kx, kw1, kb1, kw2, kb2 = jax.random.split(key, 5)

    x = jax.random.normal(kx, (N, in_channels), dtype=jnp.float32)

    # Deterministic parameter init (Kaiming-uniform-like bounds of nn.Linear).
    lim1 = 1.0 / (in_channels ** 0.5)
    w1 = jax.random.uniform(kw1, (in_channels, hidden_channels),
                            minval=-lim1, maxval=lim1, dtype=jnp.float32)
    b1 = jax.random.uniform(kb1, (hidden_channels,),
                            minval=-lim1, maxval=lim1, dtype=jnp.float32)
    lim2 = 1.0 / (hidden_channels ** 0.5)
    w2 = jax.random.uniform(kw2, (hidden_channels, out_channels),
                            minval=-lim2, maxval=lim2, dtype=jnp.float32)
    b2 = jax.random.uniform(kb2, (out_channels,),
                            minval=-lim2, maxval=lim2, dtype=jnp.float32)

    ref = _reference(x, w1, b1, w2, b2)

    # f32 path (exact check).
    out = jax.block_until_ready(node_feature_model(x, w1, b1, w2, b2))
    assert out.shape == (N, out_channels)
    assert out.dtype == jnp.float32
    assert jnp.allclose(out, ref, atol=1e-5, rtol=1e-5), "f32 mismatch vs reference"

    # bf16-streamed x (weights stay f32 inside the kernel); loose tolerance.
    out_bf16 = jax.block_until_ready(
        node_feature_model(x.astype(jnp.bfloat16), w1, b1, w2, b2))
    assert out_bf16.shape == (N, out_channels)
    assert jnp.allclose(out_bf16, ref, atol=1e-1, rtol=1e-1), "bf16-x mismatch"

    # Non-divisible node count + multi-step grid: exercises padding, the
    # packed row-major output across tiles, and pipelining.
    N2 = 300
    x2 = jax.random.normal(jax.random.PRNGKey(1), (N2, in_channels), jnp.float32)
    out2 = jax.block_until_ready(
        node_feature_model(x2, w1, b1, w2, b2, row_tile=256))
    ref2 = _reference(x2, w1, b1, w2, b2)
    assert out2.shape == (N2, out_channels)
    assert jnp.allclose(out2, ref2, atol=1e-5, rtol=1e-5), "ragged-N mismatch"

    # Mid-size graph with the default tiling heuristic (>= 8 grid steps so both
    # v7x TensorCores get work even below the 16K row-tile cap).
    N3 = 4096
    x3 = jax.random.normal(jax.random.PRNGKey(2), (N3, in_channels), jnp.float32)
    out3 = jax.block_until_ready(node_feature_model(x3, w1, b1, w2, b2))
    ref3 = _reference(x3, w1, b1, w2, b2)
    assert out3.shape == (N3, out_channels)
    assert jnp.allclose(out3, ref3, atol=1e-5, rtol=1e-5), "mid-size mismatch"

    print("KERNEL_OK")
</pallas_src>

<mosaic_0001>
module attributes {stable_mosaic.version = 11 : i64} {
  func.func @_kernel_packed(%arg0: i32, %arg1: memref<256x16xf32, #tpu.memory_space<vmem>>, %arg2: memref<32x16xf32, #tpu.memory_space<vmem>>, %arg3: memref<32x1xf32, #tpu.memory_space<vmem>>, %arg4: memref<8x32xf32, #tpu.memory_space<vmem>>, %arg5: memref<8x1xf32, #tpu.memory_space<vmem>>, %arg6: memref<16x128xf32, #tpu.memory_space<vmem>>) attributes {dimension_semantics = [#tpu.dimension_semantics<parallel>], iteration_bounds = array<i64: 1>, scalar_prefetch = 0 : i64, scratch_operands = 0 : i64, tpu.core_type = #tpu.core_type<tc>, window_params = [{transform_indices = @transform_0, window_bounds = array<i64: 256, 16>}, {pipeline_mode = #tpu.pipeline_mode<synchronous>, transform_indices = @transform_1, window_bounds = array<i64: 32, 16>}, {pipeline_mode = #tpu.pipeline_mode<synchronous>, transform_indices = @transform_2, window_bounds = array<i64: 32, 1>}, {pipeline_mode = #tpu.pipeline_mode<synchronous>, transform_indices = @transform_3, window_bounds = array<i64: 8, 32>}, {pipeline_mode = #tpu.pipeline_mode<synchronous>, transform_indices = @transform_4, window_bounds = array<i64: 8, 1>}, {transform_indices = @transform_5, window_bounds = array<i64: 16, 128>}]} {
    %c0 = arith.constant 0 : index
    %c0_0 = arith.constant 0 : index
    %0 = vector.load %arg1[%c0, %c0_0] : memref<256x16xf32, #tpu.memory_space<vmem>>, vector<256x16xf32>
    %c0_1 = arith.constant 0 : index
    %c0_2 = arith.constant 0 : index
    %1 = vector.load %arg2[%c0_1, %c0_2] : memref<32x16xf32, #tpu.memory_space<vmem>>, vector<32x16xf32>
    %cst = arith.constant dense<0.000000e+00> : vector<32x256xf32>
    %2 = tpu.matmul %1, %0, %cst {dimension_numbers = #tpu.dot_dimension_numbers<[1], [1], [0], [0], [0, 0, 1, 0], [], []>} : vector<32x16xf32>, vector<256x16xf32>, vector<32x256xf32> -> vector<32x256xf32>
    %c0_3 = arith.constant 0 : index
    %c0_4 = arith.constant 0 : index
    %3 = vector.load %arg3[%c0_3, %c0_4] : memref<32x1xf32, #tpu.memory_space<vmem>>, vector<32x1xf32>
    %4 = vector.broadcast %3 : vector<32x1xf32> to vector<32x256xf32>
    %5 = arith.addf %2, %4 : vector<32x256xf32>
    %cst_5 = arith.constant 0.000000e+00 : f32
    %6 = vector.broadcast %cst_5 : f32 to vector<32x256xf32>
    %7 = arith.maximumf %5, %6 : vector<32x256xf32>
    %c0_6 = arith.constant 0 : index
    %c0_7 = arith.constant 0 : index
    %8 = vector.load %arg4[%c0_6, %c0_7] : memref<8x32xf32, #tpu.memory_space<vmem>>, vector<8x32xf32>
    %cst_8 = arith.constant dense<0.000000e+00> : vector<8x256xf32>
    %9 = tpu.matmul %8, %7, %cst_8 {dimension_numbers = #tpu.dot_dimension_numbers<[1], [0], [0], [1], [0, 0, 1, 1], [], []>} : vector<8x32xf32>, vector<32x256xf32>, vector<8x256xf32> -> vector<8x256xf32>
    %c0_9 = arith.constant 0 : index
    %c0_10 = arith.constant 0 : index
    %10 = vector.load %arg5[%c0_9, %c0_10] : memref<8x1xf32, #tpu.memory_space<vmem>>, vector<8x1xf32>
    %11 = vector.broadcast %10 : vector<8x1xf32> to vector<8x256xf32>
    %12 = arith.addf %9, %11 : vector<8x256xf32>
    %cst_11 = arith.constant dense<0xFF800000> : vector<256xf32>
    %13 = vector.multi_reduction <maximumf>, %12, %cst_11 [0] : vector<8x256xf32> to vector<256xf32>
    %14 = vector.shape_cast %13 : vector<256xf32> to vector<1x256xf32>
    %15 = vector.broadcast %14 : vector<1x256xf32> to vector<8x256xf32>
    %16 = arith.subf %12, %15 : vector<8x256xf32>
    %17 = math.exp %16 : vector<8x256xf32>
    %cst_12 = arith.constant dense<0.000000e+00> : vector<256xf32>
    %18 = vector.multi_reduction <add>, %17, %cst_12 [0] : vector<8x256xf32> to vector<256xf32>
    %19 = vector.shape_cast %18 : vector<256xf32> to vector<1x256xf32>
    %20 = math.log %19 : vector<1x256xf32>
    %21 = vector.broadcast %20 : vector<1x256xf32> to vector<8x256xf32>
    %22 = arith.subf %16, %21 : vector<8x256xf32>
    %23 = tpu.transpose %22, [1, 0] : vector<8x256xf32> -> vector<256x8xf32>
    %24 = vector.shape_cast %23 : vector<256x8xf32> to vector<16x128xf32>
    %c0_13 = arith.constant 0 : index
    %c0_14 = arith.constant 0 : index
    %25 = vector.load %arg6[%c0_13, %c0_14] : memref<16x128xf32, #tpu.memory_space<vmem>>, vector<16x128xf32>
    tpu.vector_store %arg6[%c0_13, %c0_14], %24 {strides = array<i32>} : memref<16x128xf32, #tpu.memory_space<vmem>>, vector<16x128xf32>,
    return
  }
  func.func @transform_0(%arg0: i32) -> (i32, i32) {
    %c0_i32 = arith.constant 0 : i32
    %c0_i32_0 = arith.constant 0 : i32
    return %arg0, %c0_i32 : i32, i32
  }
  func.func @transform_1(%arg0: i32) -> (i32, i32) {
    %c0_i32 = arith.constant 0 : i32
    %c0_i32_0 = arith.constant 0 : i32
    %c0_i32_1 = arith.constant 0 : i32
    return %c0_i32, %c0_i32_0 : i32, i32
  }
  func.func @transform_2(%arg0: i32) -> (i32, i32) {
    %c0_i32 = arith.constant 0 : i32
    %c0_i32_0 = arith.constant 0 : i32
    %c0_i32_1 = arith.constant 0 : i32
    return %c0_i32, %c0_i32_0 : i32, i32
  }
  func.func @transform_3(%arg0: i32) -> (i32, i32) {
    %c0_i32 = arith.constant 0 : i32
    %c0_i32_0 = arith.constant 0 : i32
    %c0_i32_1 = arith.constant 0 : i32
    return %c0_i32, %c0_i32_0 : i32, i32
  }
  func.func @transform_4(%arg0: i32) -> (i32, i32) {
    %c0_i32 = arith.constant 0 : i32
    %c0_i32_0 = arith.constant 0 : i32
    %c0_i32_1 = arith.constant 0 : i32
    return %c0_i32, %c0_i32_0 : i32, i32
  }
  func.func @transform_5(%arg0: i32) -> (i32, i32) {
    %c0_i32 = arith.constant 0 : i32
    %c0_i32_0 = arith.constant 0 : i32
    return %arg0, %c0_i32 : i32, i32
  }
}

module attributes {stable_mosaic.version = 11 : i64} {
  func.func @_kernel_nodeminor(%arg0: i32, %arg1: memref<256x16xf32, #tpu.memory_space<vmem>>, %arg2: memref<32x16xf32, #tpu.memory_space<vmem>>, %arg3: memref<32x1xf32, #tpu.memory_space<vmem>>, %arg4: memref<8x32xf32, #tpu.memory_space<vmem>>, %arg5: memref<8x1xf32, #tpu.memory_space<vmem>>, %arg6: memref<8x256xf32, #tpu.memory_space<vmem>>) attributes {dimension_semantics = [#tpu.dimension_semantics<parallel>], iteration_bounds = array<i64: 1>, scalar_prefetch = 0 : i64, scratch_operands = 0 : i64, tpu.core_type = #tpu.core_type<tc>, window_params = [{transform_indices = @transform_0, window_bounds = array<i64: 256, 16>}, {pipeline_mode = #tpu.pipeline_mode<synchronous>, transform_indices = @transform_1, window_bounds = array<i64: 32, 16>}, {pipeline_mode = #tpu.pipeline_mode<synchronous>, transform_indices = @transform_2, window_bounds = array<i64: 32, 1>}, {pipeline_mode = #tpu.pipeline_mode<synchronous>, transform_indices = @transform_3, window_bounds = array<i64: 8, 32>}, {pipeline_mode = #tpu.pipeline_mode<synchronous>, transform_indices = @transform_4, window_bounds = array<i64: 8, 1>}, {transform_indices = @transform_5, window_bounds = array<i64: 8, 256>}]} {
    %c0 = arith.constant 0 : index
    %c0_0 = arith.constant 0 : index
    %0 = vector.load %arg1[%c0, %c0_0] : memref<256x16xf32, #tpu.memory_space<vmem>>, vector<256x16xf32>
    %c0_1 = arith.constant 0 : index
    %c0_2 = arith.constant 0 : index
    %1 = vector.load %arg2[%c0_1, %c0_2] : memref<32x16xf32, #tpu.memory_space<vmem>>, vector<32x16xf32>
    %cst = arith.constant dense<0.000000e+00> : vector<32x256xf32>
    %2 = tpu.matmul %1, %0, %cst {dimension_numbers = #tpu.dot_dimension_numbers<[1], [1], [0], [0], [0, 0, 1, 0], [], []>} : vector<32x16xf32>, vector<256x16xf32>, vector<32x256xf32> -> vector<32x256xf32>
    %c0_3 = arith.constant 0 : index
    %c0_4 = arith.constant 0 : index
    %3 = vector.load %arg3[%c0_3, %c0_4] : memref<32x1xf32, #tpu.memory_space<vmem>>, vector<32x1xf32>
    %4 = vector.broadcast %3 : vector<32x1xf32> to vector<32x256xf32>
    %5 = arith.addf %2, %4 : vector<32x256xf32>
    %cst_5 = arith.constant 0.000000e+00 : f32
    %6 = vector.broadcast %cst_5 : f32 to vector<32x256xf32>
    %7 = arith.maximumf %5, %6 : vector<32x256xf32>
    %c0_6 = arith.constant 0 : index
    %c0_7 = arith.constant 0 : index
    %8 = vector.load %arg4[%c0_6, %c0_7] : memref<8x32xf32, #tpu.memory_space<vmem>>, vector<8x32xf32>
    %cst_8 = arith.constant dense<0.000000e+00> : vector<8x256xf32>
    %9 = tpu.matmul %8, %7, %cst_8 {dimension_numbers = #tpu.dot_dimension_numbers<[1], [0], [0], [1], [0, 0, 1, 1], [], []>} : vector<8x32xf32>, vector<32x256xf32>, vector<8x256xf32> -> vector<8x256xf32>
    %c0_9 = arith.constant 0 : index
    %c0_10 = arith.constant 0 : index
    %10 = vector.load %arg5[%c0_9, %c0_10] : memref<8x1xf32, #tpu.memory_space<vmem>>, vector<8x1xf32>
    %11 = vector.broadcast %10 : vector<8x1xf32> to vector<8x256xf32>
    %12 = arith.addf %9, %11 : vector<8x256xf32>
    %cst_11 = arith.constant dense<0xFF800000> : vector<256xf32>
    %13 = vector.multi_reduction <maximumf>, %12, %cst_11 [0] : vector<8x256xf32> to vector<256xf32>
    %14 = vector.shape_cast %13 : vector<256xf32> to vector<1x256xf32>
    %15 = vector.broadcast %14 : vector<1x256xf32> to vector<8x256xf32>
    %16 = arith.subf %12, %15 : vector<8x256xf32>
    %17 = math.exp %16 : vector<8x256xf32>
    %cst_12 = arith.constant dense<0.000000e+00> : vector<256xf32>
    %18 = vector.multi_reduction <add>, %17, %cst_12 [0] : vector<8x256xf32> to vector<256xf32>
    %19 = vector.shape_cast %18 : vector<256xf32> to vector<1x256xf32>
    %20 = math.log %19 : vector<1x256xf32>
    %21 = vector.broadcast %20 : vector<1x256xf32> to vector<8x256xf32>
    %22 = arith.subf %16, %21 : vector<8x256xf32>
    %c0_13 = arith.constant 0 : index
    %c0_14 = arith.constant 0 : index
    %23 = vector.load %arg6[%c0_13, %c0_14] : memref<8x256xf32, #tpu.memory_space<vmem>>, vector<8x256xf32>
    tpu.vector_store %arg6[%c0_13, %c0_14], %22 {strides = array<i32>} : memref<8x256xf32, #tpu.memory_space<vmem>>, vector<8x256xf32>,
    return
  }
  func.func @transform_0(%arg0: i32) -> (i32, i32) {
    %c0_i32 = arith.constant 0 : i32
    %c0_i32_0 = arith.constant 0 : i32
    return %arg0, %c0_i32 : i32, i32
  }
  func.func @transform_1(%arg0: i32) -> (i32, i32) {
    %c0_i32 = arith.constant 0 : i32
    %c0_i32_0 = arith.constant 0 : i32
    %c0_i32_1 = arith.constant 0 : i32
    return %c0_i32, %c0_i32_0 : i32, i32
  }
  func.func @transform_2(%arg0: i32) -> (i32, i32) {
    %c0_i32 = arith.constant 0 : i32
    %c0_i32_0 = arith.constant 0 : i32
    %c0_i32_1 = arith.constant 0 : i32
    return %c0_i32, %c0_i32_0 : i32, i32
  }
  func.func @transform_3(%arg0: i32) -> (i32, i32) {
    %c0_i32 = arith.constant 0 : i32
    %c0_i32_0 = arith.constant 0 : i32
    %c0_i32_1 = arith.constant 0 : i32
    return %c0_i32, %c0_i32_0 : i32, i32
  }
  func.func @transform_4(%arg0: i32) -> (i32, i32) {
    %c0_i32 = arith.constant 0 : i32
    %c0_i32_0 = arith.constant 0 : i32
    %c0_i32_1 = arith.constant 0 : i32
    return %c0_i32, %c0_i32_0 : i32, i32
  }
  func.func @transform_5(%arg0: i32) -> (i32, i32) {
    %c0_i32 = arith.constant 0 : i32
    %c0_i32_0 = arith.constant 0 : i32
    return %c0_i32, %arg0 : i32, i32
  }
}

</mosaic_0001>

<bundles_post_ra>
// kernel: tpu_custom_call.1
= control target key start
LH: loop header
LB: loop body
LE: loop exit
PB: predicated region body
PF: predicated region fallthrough
CT: control target
= control target key end

     0   :  { %vm81_vm0 = vcmask 130048   ;;  %s643_s0 = inlined_call_operand.vmem [shape: f32[256,16], index: 0, kind: input, shape index: {}]   ;;  %s644_s1 = inlined_call_operand.vmem [shape: f32[32,16], index: 1, kind: input, shape index: {}]   ;;  %s645_s2 = inlined_call_operand.vmem [shape: f32[32,1], index: 2, kind: input, shape index: {}]   ;;  %s646_s3 = inlined_call_operand.vmem [shape: f32[8,32], index: 3, kind: input, shape index: {}]   ;;  %s647_s4 = inlined_call_operand.vmem [shape: f32[8,1], index: 4, kind: input, shape index: {}]   ;;  %s648_s5 = inlined_call_operand.hbm [shape: f32[8,256], index: 5, kind: output, shape index: {}]  }
   0x1   :  { %v36_v0 = vld [vmem:[%s643_s0 + $0x78] sm:$0xff]  ;;  %v35_v2 = vld [vmem:[%s643_s0 + $0x70] sm:$0xff]  ;;  %v34_v4 = vld [vmem:[%s643_s0 + $0x68] sm:$0xff] }
   0x2   :  { %v52_v1 = vld [vmem:[%s643_s0 + $0xf8] sm:$0xff]  ;;  %361 = vmatpush.xpose.msk.msra.mxu0 %vm81_vm0, %v36_v0  ;;  %v51_v3 = vld [vmem:[%s643_s0 + $0xf0] sm:$0xff]  ;;  %v50_v5 = vld [vmem:[%s643_s0 + $0xe8] sm:$0xff] }
   0x3   :  { %381 = vmatpush.xpose.msk.msra.mxu1 %vm81_vm0, %v52_v1 }
   0x6   :  { %362 = vmatpush.xpose.msk.msra.mxu0 %vm81_vm0, %v35_v2 }
   0x7   :  { %382 = vmatpush.xpose.msk.msra.mxu1 %vm81_vm0, %v51_v3 }
   0x8   :  { %10 = vsyncpa [#allocation3], 0  ;;  %v33_v6 = vld [vmem:[%s643_s0 + $0x60] sm:$0xff]  ;;  %v32_v8 = vld [vmem:[%s643_s0 + $0x58] sm:$0xff]  ;;  %v442_v21 = vmov 0   ;;  %vm263_vm1 = vcmask 261120  }
   0x9   :  { %v49_v7 = vld [vmem:[%s643_s0 + $0xe0] sm:$0xff]  ;;  %v48_v9 = vld [vmem:[%s643_s0 + $0xd8] sm:$0xff]  ;;  %v31_v10 = vld [vmem:[%s643_s0 + $0x50] sm:$0xff]  ;;  %406 = vset.pattern.permute.xlu1 %v442_v21  ;;  %405 = vset.pattern.permute.xlu0 %v442_v21  ;;  %s352_s26 = sshll.u32 %s648_s5, 4  ;;  %s353_s26 = int_to_ptr.hbm [resolvable:$true] %s352_s26 }
   0xa   :  { %363 = vmatpush.xpose.msk.msra.mxu0 %vm81_vm0, %v34_v4  ;;  %v47_v11 = vld [vmem:[%s643_s0 + $0xd0] sm:$0xff]  ;;  %v30_v12 = vld [vmem:[%s643_s0 + $0x48] sm:$0xff]  ;;  %v29_v14 = vld [vmem:[%s643_s0 + $0x40] sm:$0xff]  ;;  %407 = vset.pattern.permute.xlu2 %v442_v21 }
   0xb   :  { %383 = vmatpush.xpose.msk.msra.mxu1 %vm81_vm0, %v50_v5  ;;  %v46_v13 = vld [vmem:[%s643_s0 + $0xc8] sm:$0xff]  ;;  %v45_v15 = vld [vmem:[%s643_s0 + $0xc0] sm:$0xff]  ;;  %v28_v16 = vld [vmem:[%s643_s0 + $0x38] sm:$0xff] }
   0xc   :  { %v44_v17 = vld [vmem:[%s643_s0 + $0xb8] sm:$0xff]  ;;  %v58_v18 = vld [vmem:[%s645_s2 + $0x8] sm:$0xff]  ;;  %v27_v19 = vld [vmem:[%s643_s0 + $0x30] sm:$0xff] }
   0xd   :  { %v43_v20 = vld [vmem:[%s643_s0 + $0xb0] sm:$0xff]  ;;  %68 = vperm.xlu1 %406, %v58_v18   ;;  %v26_v22 = vld [vmem:[%s643_s0 + $0x28] sm:$0xff]  ;;  %v57_v24 = vld [vmem:[%s645_s2] sm:$0xff] }
   0xe   :  { %364 = vmatpush.xpose.msk.msra.mxu0 %vm81_vm0, %v33_v6  ;;  %v42_v23 = vld [vmem:[%s643_s0 + $0xa8] sm:$0xff]  ;;  %v25_v25 = vld [vmem:[%s643_s0 + $0x20] sm:$0xff]  ;;  %v24_v27 = vld [vmem:[%s643_s0 + $0x18] sm:$0xff] }
   0xf   :  { %384 = vmatpush.xpose.msk.msra.mxu1 %vm81_vm0, %v49_v7  ;;  %v41_v26 = vld [vmem:[%s643_s0 + $0xa0] sm:$0xff]  ;;  %v40_v28 = vld [vmem:[%s643_s0 + $0x98] sm:$0xff]  ;;  %v23_v30 = vld [vmem:[%s643_s0 + $0x10] sm:$0xff] }
  0x10   :  { %v60_v29 = vld [vmem:[%s645_s2 + $0x18] sm:$0xff]  ;;  %v39_v31 = vld [vmem:[%s643_s0 + $0x90] sm:$0xff]  ;;  %v22_v32 = vld [vmem:[%s643_s0 + $0x8] sm:$0xff] }
  0x11   :  { %78 = vperm.xlu0 %405, %v60_v29   ;;  %v38_v33 = vld [vmem:[%s643_s0 + $0x88] sm:$0xff]  ;;  %v59_v34 = vld [vmem:[%s645_s2 + $0x10] sm:$0xff]  ;;  %v21_v35 = vld [vmem:[%s643_s0] sm:$0xff] }
  0x12   :  { %365 = vmatpush.xpose.msk.msra.mxu0 %vm81_vm0, %v32_v8  ;;  %v37_v36 = vld [vmem:[%s643_s0 + $0x80] sm:$0xff]  ;;  %v54_v38 = vld [vmem:[%s644_s1 + $0x8] sm:$0xff]  ;;  %v55_v39 = vld [vmem:[%s644_s1 + $0x10] sm:$0xff] }
  0x13   :  { %385 = vmatpush.xpose.msk.msra.mxu1 %vm81_vm0, %v48_v9  ;;  %v53_v37 = vld [vmem:[%s644_s1] sm:$0xff]  ;;  %v56_v40 = vld [vmem:[%s644_s1 + $0x18] sm:$0xff] }
  0x14   :  { %v257_v43 = vld [vmem:[%s647_s4] sm:$0xff] }
  0x15   :  { %63 = vperm.xlu1 %406, %v57_v24   ;;  %260 = vperm.xlu2 %407, %v257_v43   ;;  %v256_v6 = vld [vmem:[%s646_s3] sm:$0xff]  ;;  %s443_s3 = smov [#allocation2]  }
  0x16   :  { %366 = vmatpush.xpose.msk.msra.mxu0 %vm81_vm0, %v31_v10  ;;  %s350_s23 = sshll.u32 %s443_s3, 4  ;;  %s351_s23 = int_to_ptr.vmem [resolvable:$true] %s350_s23 }
  0x17   :  { %386 = vmatpush.xpose.msk.msra.mxu1 %vm81_vm0, %v47_v11 }
  0x19   :  { %73 = vperm.xlu0 %405, %v59_v34  }
  0x1a   :  { %367 = vmatpush.xpose.msk.msra.mxu0 %vm81_vm0, %v30_v12 }
  0x1b   :  { %387 = vmatpush.xpose.msk.msra.mxu1 %vm81_vm0, %v46_v13 }
  0x1e   :  { %368 = vmatpush.xpose.msk.msra.mxu0 %vm81_vm0, %v29_v14 }
  0x1f   :  { %388 = vmatpush.xpose.msk.msra.mxu1 %vm81_vm0, %v45_v15 }
  0x22   :  { %369 = vmatpush.xpose.msk.msra.mxu0 %vm81_vm0, %v28_v16 }
  0x23   :  { %389 = vmatpush.xpose.msk.msra.mxu1 %vm81_vm0, %v44_v17 }
  0x26   :  { %370 = vmatpush.xpose.msk.msra.mxu0 %vm81_vm0, %v27_v19 }
  0x27   :  { %390 = vmatpush.xpose.msk.msra.mxu1 %vm81_vm0, %v43_v20 }
  0x2a   :  { %371 = vmatpush.xpose.msk.msra.mxu0 %vm81_vm0, %v26_v22 }
  0x2b   :  { %391 = vmatpush.xpose.msk.msra.mxu1 %vm81_vm0, %v42_v23 }
  0x2e   :  { %372 = vmatpush.xpose.msk.msra.mxu0 %vm81_vm0, %v25_v25 }
  0x2f   :  { %392 = vmatpush.xpose.msk.msra.mxu1 %vm81_vm0, %v41_v26 }
  0x32   :  { %373 = vmatpush.xpose.msk.msra.mxu0 %vm81_vm0, %v24_v27 }
  0x33   :  { %393 = vmatpush.xpose.msk.msra.mxu1 %vm81_vm0, %v40_v28 }
  0x36   :  { %374 = vmatpush.xpose.msk.msra.mxu0 %vm81_vm0, %v23_v30 }
  0x37   :  { %394 = vmatpush.xpose.msk.msra.mxu1 %vm81_vm0, %v39_v31 }
  0x3a   :  { %375 = vmatpush.xpose.msk.msra.mxu0 %vm81_vm0, %v22_v32 }
  0x3b   :  { %395 = vmatpush.xpose.msk.msra.mxu1 %vm81_vm0, %v38_v33 }
  0x3e   :  { %376 = vmatpush.xpose.msk.msra.mxu0 %vm81_vm0, %v21_v35 }
  0x3f   :  { %396 = vmatpush.xpose.msk.msra.mxu1 %vm81_vm0, %v37_v36 }
  0x41   :  { %377 = vmatmul.msk.f32.vlgmr.msra.gmra.mxu0 %vm81_vm0, %v53_v37 }
  0x42   :  { %397 = vmatmul.msk.f32.vlgmr.msra.gmra.mxu1 %vm81_vm0, %v53_v37 }
  0x49   :  { %378 = vmatmul.msk.f32.gmra.mxu0 %vm81_vm0, %v54_v38 }
  0x4a   :  { %398 = vmatmul.msk.f32.gmra.mxu1 %vm81_vm0, %v54_v38 }
  0x51   :  { %379 = vmatmul.msk.f32.gmra.mxu0 %vm81_vm0, %v55_v39 }
  0x52   :  { %399 = vmatmul.msk.f32.gmra.mxu1 %vm81_vm0, %v55_v39 }
  0x59   :  { %380 = vmatmul.msk.f32.gmra.mxu0 %vm81_vm0, %v56_v40 }
  0x5a   :  { %400 = vmatmul.msk.f32.gmra.mxu1 %vm81_vm0, %v56_v40 }
  0x6f   :  { %v261_v7 = vpop.permute.xlu2 %260 }
  0x7f   :  { %v69_v47 = vpop.permute.xlu1 %68 }
  0x83   :  { %v79_v46 = vpop.permute.xlu0 %78 }
  0x87   :  { %v64_v57 = vpop.permute.xlu1 %63 }
  0x8b   :  { %v74_v50 = vpop.permute.xlu0 %73 }
  0xbe   :  { %v207_v41 = vpop.f32.mrf.mxu0 }
  0xbf   :  { %v236_v42 = vpop.f32.mrf.mxu1  ;;  %v208_v62 = vadd.f32 %v207_v41, %v64_v57 }
  0xc0   :  { %v237_v63 = vadd.f32 %v236_v42, %v64_v57 }
  0xc1   :  { %v248_v4 = vmax.f32 %v208_v62, 0.0 }
  0xc2   :  { %v249_v5 = vmax.f32 %v237_v63, 0.0 }
  0xc6   :  { %v210_v44 = vpop.f32.mrf.mxu0 }
  0xc7   :  { %v239_v45 = vpop.f32.mrf.mxu1  ;;  %v211_v58 = vadd.f32 %v210_v44, %v69_v47 }
  0xc8   :  { %v240_v59 = vadd.f32 %v239_v45, %v69_v47 }
  0xc9   :  { %v250_v2 = vmax.f32 %v211_v58, 0.0 }
  0xca   :  { %v251_v3 = vmax.f32 %v240_v59, 0.0 }
  0xce   :  { %v213_v48 = vpop.f32.mrf.mxu0 }
  0xcf   :  { %v242_v49 = vpop.f32.mrf.mxu1  ;;  %v214_v53 = vadd.f32 %v213_v48, %v74_v50 }
  0xd0   :  { %v243_v54 = vadd.f32 %v242_v49, %v74_v50 }
  0xd1   :  { %v252_v0 = vmax.f32 %v214_v53, 0.0 }
  0xd2   :  { %v253_v1 = vmax.f32 %v243_v54, 0.0 }
  0xd6   :  { %v216_v51 = vpop.f32.mrf.mxu0 }
  0xd7   :  { %v245_v52 = vpop.f32.mrf.mxu1  ;;  %v217_v55 = vadd.f32 %v216_v51, %v79_v46 }
  0xd8   :  { %v246_v56 = vadd.f32 %v245_v52, %v79_v46 }
  0xd9   :  { %v254_v60 = vmax.f32 %v217_v55, 0.0 }
  0xda   :  { %v255_v61 = vmax.f32 %v246_v56, 0.0 }
  0xdb   :  { %279 = vmatpush.msra.mxu2 %v254_v60 }
  0xdc   :  { %299 = vmatpush.msra.mxu3 %v255_v61 }
  0xdd   :  { %280 = vmatpush.msra.mxu2 %v252_v0 }
  0xde   :  { %300 = vmatpush.msra.mxu3 %v253_v1 }
  0xdf   :  { %281 = vmatpush.msra.mxu2 %v250_v2 }
  0xe0   :  { %301 = vmatpush.msra.mxu3 %v251_v3 }
  0xe1   :  { %282 = vmatpush.msra.mxu2 %v248_v4 }
  0xe2   :  { %302 = vmatpush.msra.mxu3 %v249_v5  ;;  %401 = vmatmul.msk.f32.vlgmr.msra.gmra.mxu2 %vm263_vm1, %v256_v6 }
  0xe3   :  { %402 = vmatmul.msk.f32.vlgmr.msra.gmra.mxu3 %vm263_vm1, %v256_v6 }
 0x165   :  { %v284_v8 = vpop.f32.mrf.mxu2 }
 0x166   :  { %v304_v9 = vpop.f32.mrf.mxu3  ;;  %v285_v10 = vadd.f32 %v284_v8, %v261_v7 }
 0x167   :  { %v305_v11 = vadd.f32 %v304_v9, %v261_v7 }
 0x168   :  { %v307_v12 = vrot.slane %v285_v10, 4 }
 0x169   :  { %v313_v13 = vrot.slane %v305_v11, 4 }
 0x16a   :  { %v308_v14 = vmax.f32 %v285_v10, %v307_v12 }
 0x16b   :  { %v314_v15 = vmax.f32 %v305_v11, %v313_v13 }
 0x16c   :  { %v309_v16 = vrot.slane %v308_v14, 2 }
 0x16d   :  { %v315_v17 = vrot.slane %v314_v15, 2 }
 0x16e   :  { %v310_v18 = vmax.f32 %v308_v14, %v309_v16 }
 0x16f   :  { %v316_v19 = vmax.f32 %v314_v15, %v315_v17 }
 0x170   :  { %v311_v20 = vrot.slane %v310_v18, 1 }
 0x171   :  { %v317_v21 = vrot.slane %v316_v19, 1 }
 0x172   :  { %v312_v22 = vmax.f32 %v310_v18, %v311_v20 }
 0x173   :  { %v318_v23 = vmax.f32 %v316_v19, %v317_v21 }
 0x174   :  { %v319_v24 = vsub.f32 %v285_v10, %v312_v22 }
 0x175   :  { %v320_v25 = vsub.f32 %v305_v11, %v318_v23 }
 0x176   :  { %v321_v26 = vmul.f32 1.442695, %v319_v24 }
 0x177   :  { %v323_v27 = vmul.f32 1.442695, %v320_v25 }
 0x178   :  { %408 = vpow2.f32 %v321_v26 }
 0x179   :  { %410 = vpow2.f32 %v323_v27 }
 0x17e   :  { %v409_v28 = vpop.eup %408 }
 0x17f   :  { %v411_v29 = vpop.eup %410  ;;  %v325_v30 = vrot.slane %v409_v28, 4 }
 0x180   :  { %v331_v31 = vrot.slane %v411_v29, 4 }
 0x181   :  { %v326_v32 = vadd.f32 %v409_v28, %v325_v30 }
 0x182   :  { %v332_v33 = vadd.f32 %v411_v29, %v331_v31 }
 0x183   :  { %v327_v34 = vrot.slane %v326_v32, 2 }
 0x184   :  { %v333_v35 = vrot.slane %v332_v33, 2 }
 0x185   :  { %v328_v36 = vadd.f32 %v327_v34, %v326_v32 }
 0x186   :  { %v334_v37 = vadd.f32 %v333_v35, %v332_v33 }
 0x187   :  { %v329_v38 = vrot.slane %v328_v36, 1 }
 0x188   :  { %v335_v39 = vrot.slane %v334_v37, 1 }
 0x189   :  { %v330_v40 = vadd.f32 %v329_v38, %v328_v36 }
 0x18a   :  { %v336_v41 = vadd.f32 %v335_v39, %v334_v37 }
 0x18b   :  { %412 = vlog2.f32 %v330_v40 }
 0x18c   :  { %414 = vlog2.f32 %v336_v41 }
 0x191   :  { %v413_v42 = vpop.eup %412 }
 0x192   :  { %v415_v43 = vpop.eup %414  ;;  %v338_v44 = vmul.f32 0.6931472, %v413_v42 }
 0x193   :  { %v340_v45 = vmul.f32 0.6931472, %v415_v43 }
 0x194   :  { %v341_v46 = vsub.f32 %v319_v24, %v338_v44 }
 0x195   :  { %v342_v47 = vsub.f32 %v320_v25, %v340_v45 }
 0x196   :  { %343 = vst [vmem:[#allocation2] sm:$0xff] %v341_v46 }
 0x197   :  { %344 = vst [vmem:[#allocation2 + $0x8] sm:$0xff] %v342_v47 }
 0x198   :  { %355 = dma.vmem_to_hbm [thread:$0]  %s351_s23, 256, %s353_s26, [#allocation3]  }
 0x199   :  { %440 = dma.done.wait [#allocation3], 256  }
 0x19a   :  { %441 = vsyncadd [#allocation3], 4294967040 }
 0x19b   :  { %360 = vsyncpa [#allocation3], 1 }

</bundles_post_ra>
